<compile_context>
chip_gen: v7x
topology: tpu7x:2x2x1
jax: 0.10.0
libtpu: 0.0.40
codegen_flags: <defaults>
</compile_context>

<pallas_src>
import jax
import jax.numpy as jnp
from jax.experimental import pallas as pl
from jax.experimental.pallas import tpu as pltpu


def _critic_kernel(x_ref, w1_ref, b1_ref, wih_ref, whh_ref, bl_ref, w3_ref,
                   b3_ref, y_ref, h_out_ref, c_out_ref, hall_sc):
    TB, _ = x_ref.shape            # T*B rows, time-major flattened
    B, H = h_out_ref.shape
    T = TB // B

    # ---- Hoisted time-parallel work: one batched MXU matmul over all T*B rows.
    x = x_ref[...]                                                     # (T*B, D_in)
    z = jnp.dot(x, w1_ref[...], preferred_element_type=jnp.float32) + b1_ref[...]
    z = jnp.maximum(z, 0.0)                                            # fc1 + ReLU
    gates_x = (jnp.dot(z, wih_ref[...], preferred_element_type=jnp.float32)
               + bl_ref[...])                                          # (T*B, 4H)

    whh = whh_ref[...]                                                 # (H, 4H)

    # ---- Serial LSTM recurrence, fully unrolled (T is static at trace time,
    # equivalent to lax.fori_loop(..., unroll=True)).  Only h @ W_hh + VPU/EUP
    # gate math remain on the per-step critical path.
    h = jnp.zeros((B, H), jnp.float32)
    c = jnp.zeros((B, H), jnp.float32)
    for t in range(T):
        g = gates_x[t * B:(t + 1) * B, :] + jnp.dot(
            h, whh, preferred_element_type=jnp.float32)                # (B, 4H)
        # PyTorch gate order: i, f, g, o.  (Static 32-lane slices of one
        # 128-lane gates vreg; keeps the recurrent MXU push count at 1/step.)
        i_g = jax.nn.sigmoid(g[:, 0 * H:1 * H])
        f_g = jax.nn.sigmoid(g[:, 1 * H:2 * H])
        g_g = jnp.tanh(g[:, 2 * H:3 * H])
        o_g = jax.nn.sigmoid(g[:, 3 * H:4 * H])
        c = f_g * c + i_g * g_g
        h = o_g * jnp.tanh(c)
        hall_sc[pl.ds(t * B, B), :] = h                                # static-index store

    # ---- fc3 applied once over all timesteps: VPU multiply + lane reduction
    # over the lane-dense h slab (no per-step N=1 MXU matmul / lane-1 stores).
    h_all = hall_sc[...]                                               # (T*B, H)
    y = jnp.sum(h_all * w3_ref[...], axis=-1, keepdims=True) + b3_ref[...]
    y_ref[...] = y.astype(y_ref.dtype)
    h_out_ref[...] = h.astype(h_out_ref.dtype)
    c_out_ref[...] = c.astype(c_out_ref.dtype)


def continuous_q_critic_forward(ot, at, params):
    """ot: (B, T, o_dim), at: (B, T, a_dim), float32.  Returns (y, (h, c)) with
    y: (B, T, 1), h/c: (1, B, H) matching PyTorch's nn.LSTM outputs."""
    w1, b1, w_ih, w_hh, b_lstm, w3, b3 = (
        params["w1"], params["b1"], params["w_ih"], params["w_hh"],
        params["b_lstm"], params["w3"], params["b3"])

    B, T, o_dim = ot.shape
    a_dim = at.shape[-1]
    D_in = o_dim + a_dim
    H = w1.shape[1]

    # glue: concat + time-major flatten to (T*B, D_in) so all time-parallel
    # matmuls run as single well-shaped MXU passes inside the kernel.
    x_cat = jnp.concatenate([ot, at], axis=-1)                # (B, T, D_in)
    x_flat = jnp.transpose(x_cat, (1, 0, 2)).reshape(T * B, D_in)
    w3_row = jnp.transpose(w3)                                # (1, H) row for in-kernel VPU fc3

    grid_spec = pltpu.PrefetchScalarGridSpec(
        num_scalar_prefetch=0,
        grid=(1,),                                            # single step; time loop is in-kernel
        in_specs=[
            pl.BlockSpec((T * B, D_in), lambda i: (0, 0)),    # x (time-major, flattened)
            pl.BlockSpec((D_in, H), lambda i: (0, 0)),        # fc1 weight
            pl.BlockSpec((1, H), lambda i: (0, 0)),           # fc1 bias
            pl.BlockSpec((H, 4 * H), lambda i: (0, 0)),       # lstm W_ih
            pl.BlockSpec((H, 4 * H), lambda i: (0, 0)),       # lstm W_hh
            pl.BlockSpec((1, 4 * H), lambda i: (0, 0)),       # lstm bias (b_ih + b_hh)
            pl.BlockSpec((1, H), lambda i: (0, 0)),           # fc3 weight row
            pl.BlockSpec((1, 1), lambda i: (0, 0)),           # fc3 bias
        ],
        out_specs=[
            pl.BlockSpec((T * B, 1), lambda i: (0, 0)),       # y (time-major, flattened)
            pl.BlockSpec((B, H), lambda i: (0, 0)),           # final h
            pl.BlockSpec((B, H), lambda i: (0, 0)),           # final c
        ],
        scratch_shapes=[
            pltpu.VMEM((T * B, H), jnp.float32),              # all h_t (lane-dense slab)
        ],
    )

    y_flat, h_fin, c_fin = pl.pallas_call(
        _critic_kernel,
        out_shape=(
            jax.ShapeDtypeStruct((T * B, 1), jnp.float32),
            jax.ShapeDtypeStruct((B, H), jnp.float32),
            jax.ShapeDtypeStruct((B, H), jnp.float32),
        ),
        grid_spec=grid_spec,
        compiler_params=pltpu.CompilerParams(
            dimension_semantics=("arbitrary",)),              # sequential LSTM recurrence
    )(x_flat, w1, b1, w_ih, w_hh, b_lstm, w3_row, b3)

    y = jnp.transpose(y_flat.reshape(T, B, 1), (1, 0, 2))     # back to batch_first (B, T, 1)
    h = h_fin[None, :, :]                                     # (num_layers=1, B, H)
    c = c_fin[None, :, :]
    return y, (h, c)


def init_params(key, a_dim, o_dim, hidden_dim):
    D_in = a_dim + o_dim
    H = hidden_dim
    ks = jax.random.split(key, 8)
    # kaiming_normal (fan_in) for fc1/fc3 weights; nn.Linear-style uniform biases;
    # LSTM params U(-1/sqrt(H), 1/sqrt(H)); b_lstm = b_ih + b_hh (sum of two uniforms).
    w1 = jax.random.normal(ks[0], (D_in, H), jnp.float32) * jnp.sqrt(2.0 / D_in)
    kb1 = 1.0 / jnp.sqrt(D_in)
    b1 = jax.random.uniform(ks[1], (1, H), jnp.float32, -kb1, kb1)
    k = 1.0 / jnp.sqrt(H)
    w_ih = jax.random.uniform(ks[2], (H, 4 * H), jnp.float32, -k, k)
    w_hh = jax.random.uniform(ks[3], (H, 4 * H), jnp.float32, -k, k)
    b_ih = jax.random.uniform(ks[4], (1, 4 * H), jnp.float32, -k, k)
    b_hh = jax.random.uniform(ks[5], (1, 4 * H), jnp.float32, -k, k)
    w3 = jax.random.normal(ks[6], (H, 1), jnp.float32) * jnp.sqrt(2.0 / H)
    kb3 = 1.0 / jnp.sqrt(H)
    b3 = jax.random.uniform(ks[7], (1, 1), jnp.float32, -kb3, kb3)
    return dict(w1=w1, b1=b1, w_ih=w_ih, w_hh=w_hh, b_lstm=b_ih + b_hh, w3=w3, b3=b3)


def _reference_forward(ot, at, params):
    """Pure-JAX reference of the PyTorch forward (correctness check only)."""
    w1, b1, w_ih, w_hh, b_lstm, w3, b3 = (
        params["w1"], params["b1"], params["w_ih"], params["w_hh"],
        params["b_lstm"], params["w3"], params["b3"])
    B, T, _ = ot.shape
    H = w1.shape[1]
    x = jnp.concatenate([ot, at], axis=-1)
    z = jax.nn.relu(x @ w1 + b1)                              # (B, T, H)

    def cell(carry, z_t):
        h, c = carry
        g = z_t @ w_ih + h @ w_hh + b_lstm
        i = jax.nn.sigmoid(g[:, 0 * H:1 * H])
        f = jax.nn.sigmoid(g[:, 1 * H:2 * H])
        gg = jnp.tanh(g[:, 2 * H:3 * H])
        o = jax.nn.sigmoid(g[:, 3 * H:4 * H])
        c = f * c + i * gg
        h = o * jnp.tanh(c)
        return (h, c), h

    z_tm = jnp.transpose(z, (1, 0, 2))                        # (T, B, H)
    init = (jnp.zeros((B, H), jnp.float32), jnp.zeros((B, H), jnp.float32))
    (h, c), hs = jax.lax.scan(cell, init, z_tm)
    y = jnp.transpose(hs, (1, 0, 2)) @ w3 + b3                # (B, T, 1)
    return y, (h[None], c[None])


if __name__ == "__main__":
    a_dim, o_dim, hidden_dim = 4, 12, 32
    B, T = 2, 8

    key = jax.random.PRNGKey(0)
    k_ot, k_at, k_atm1, k_p = jax.random.split(key, 4)
    ot = jax.random.normal(k_ot, (B, T, o_dim), jnp.float32)
    at = jax.random.normal(k_at, (B, T, a_dim), jnp.float32)
    atm1 = jax.random.normal(k_atm1, (B, T, a_dim), jnp.float32)  # unused by forward (matches PyTorch)

    params = init_params(k_p, a_dim, o_dim, hidden_dim)

    y, (h, c) = continuous_q_critic_forward(ot, at, params)
    jax.block_until_ready((y, h, c))

    assert y.shape == (B, T, 1)
    assert h.shape == (1, B, hidden_dim)
    assert c.shape == (1, B, hidden_dim)

    # Correctness vs pure-JAX reference (loose tol: MXU multipass / EUP transcendentals).
    y_ref, (h_ref, c_ref) = _reference_forward(ot, at, params)
    assert jnp.allclose(y, y_ref, rtol=1e-2, atol=1e-2)
    assert jnp.allclose(h, h_ref, rtol=1e-2, atol=1e-2)
    assert jnp.allclose(c, c_ref, rtol=1e-2, atol=1e-2)

    print("KERNEL_OK")
</pallas_src>

<mosaic_0001>
module attributes {stable_mosaic.version = 11 : i64} {
  func.func @_critic_kernel(%arg0: i32, %arg1: memref<16x16xf32, #tpu.memory_space<vmem>>, %arg2: memref<16x32xf32, #tpu.memory_space<vmem>>, %arg3: memref<1x32xf32, #tpu.memory_space<vmem>>, %arg4: memref<32x128xf32, #tpu.memory_space<vmem>>, %arg5: memref<32x128xf32, #tpu.memory_space<vmem>>, %arg6: memref<1x128xf32, #tpu.memory_space<vmem>>, %arg7: memref<1x32xf32, #tpu.memory_space<vmem>>, %arg8: memref<1x1xf32, #tpu.memory_space<vmem>>, %arg9: memref<16x1xf32, #tpu.memory_space<vmem>>, %arg10: memref<2x32xf32, #tpu.memory_space<vmem>>, %arg11: memref<2x32xf32, #tpu.memory_space<vmem>>, %arg12: memref<16x32xf32, #tpu.memory_space<vmem>>) attributes {dimension_semantics = [#tpu.dimension_semantics<arbitrary>], iteration_bounds = array<i64: 1>, scalar_prefetch = 0 : i64, scratch_operands = 1 : i64, tpu.core_type = #tpu.core_type<tc>, window_params = [{pipeline_mode = #tpu.pipeline_mode<synchronous>, transform_indices = @transform_0, window_bounds = array<i64: 16, 16>}, {pipeline_mode = #tpu.pipeline_mode<synchronous>, transform_indices = @transform_1, window_bounds = array<i64: 16, 32>}, {pipeline_mode = #tpu.pipeline_mode<synchronous>, transform_indices = @transform_2, window_bounds = array<i64: 1, 32>}, {pipeline_mode = #tpu.pipeline_mode<synchronous>, transform_indices = @transform_3, window_bounds = array<i64: 32, 128>}, {pipeline_mode = #tpu.pipeline_mode<synchronous>, transform_indices = @transform_4, window_bounds = array<i64: 32, 128>}, {pipeline_mode = #tpu.pipeline_mode<synchronous>, transform_indices = @transform_5, window_bounds = array<i64: 1, 128>}, {pipeline_mode = #tpu.pipeline_mode<synchronous>, transform_indices = @transform_6, window_bounds = array<i64: 1, 32>}, {pipeline_mode = #tpu.pipeline_mode<synchronous>, transform_indices = @transform_7, window_bounds = array<i64: 1, 1>}, {pipeline_mode = #tpu.pipeline_mode<synchronous>, transform_indices = @transform_8, window_bounds = array<i64: 16, 1>}, {pipeline_mode = #tpu.pipeline_mode<synchronous>, transform_indices = @transform_9, window_bounds = array<i64: 2, 32>}, {pipeline_mode = #tpu.pipeline_mode<synchronous>, transform_indices = @transform_10, window_bounds = array<i64: 2, 32>}]} {
    %c0 = arith.constant 0 : index
    %c0_0 = arith.constant 0 : index
    %0 = vector.load %arg1[%c0, %c0_0] : memref<16x16xf32, #tpu.memory_space<vmem>>, vector<16x16xf32>
    %c0_1 = arith.constant 0 : index
    %c0_2 = arith.constant 0 : index
    %1 = vector.load %arg2[%c0_1, %c0_2] : memref<16x32xf32, #tpu.memory_space<vmem>>, vector<16x32xf32>
    %cst = arith.constant dense<0.000000e+00> : vector<16x32xf32>
    %2 = tpu.matmul %0, %1, %cst {dimension_numbers = #tpu.dot_dimension_numbers<[1], [0], [0], [1], [0, 0, 1, 1], [], []>} : vector<16x16xf32>, vector<16x32xf32>, vector<16x32xf32> -> vector<16x32xf32>
    %c0_3 = arith.constant 0 : index
    %c0_4 = arith.constant 0 : index
    %3 = vector.load %arg3[%c0_3, %c0_4] : memref<1x32xf32, #tpu.memory_space<vmem>>, vector<1x32xf32>
    %4 = vector.broadcast %3 : vector<1x32xf32> to vector<16x32xf32>
    %5 = arith.addf %2, %4 : vector<16x32xf32>
    %cst_5 = arith.constant 0.000000e+00 : f32
    %6 = vector.broadcast %cst_5 : f32 to vector<16x32xf32>
    %7 = arith.maximumf %5, %6 : vector<16x32xf32>
    %c0_6 = arith.constant 0 : index
    %c0_7 = arith.constant 0 : index
    %8 = vector.load %arg4[%c0_6, %c0_7] : memref<32x128xf32, #tpu.memory_space<vmem>>, vector<32x128xf32>
    %cst_8 = arith.constant dense<0.000000e+00> : vector<16x128xf32>
    %9 = tpu.matmul %7, %8, %cst_8 {dimension_numbers = #tpu.dot_dimension_numbers<[1], [0], [0], [1], [0, 0, 1, 1], [], []>} : vector<16x32xf32>, vector<32x128xf32>, vector<16x128xf32> -> vector<16x128xf32>
    %c0_9 = arith.constant 0 : index
    %c0_10 = arith.constant 0 : index
    %10 = vector.load %arg6[%c0_9, %c0_10] : memref<1x128xf32, #tpu.memory_space<vmem>>, vector<1x128xf32>
    %11 = vector.broadcast %10 : vector<1x128xf32> to vector<16x128xf32>
    %12 = arith.addf %9, %11 : vector<16x128xf32>
    %c0_11 = arith.constant 0 : index
    %c0_12 = arith.constant 0 : index
    %13 = vector.load %arg5[%c0_11, %c0_12] : memref<32x128xf32, #tpu.memory_space<vmem>>, vector<32x128xf32>
    %cst_13 = arith.constant 0.000000e+00 : f32
    %14 = vector.broadcast %cst_13 : f32 to vector<2x32xf32>
    %cst_14 = arith.constant 0.000000e+00 : f32
    %15 = vector.broadcast %cst_14 : f32 to vector<2x32xf32>
    %16 = vector.extract_strided_slice %12 {offsets = [0, 0], sizes = [2, 128], strides = [1, 1]} : vector<16x128xf32> to vector<2x128xf32>
    %cst_15 = arith.constant dense<0.000000e+00> : vector<2x128xf32>
    %17 = tpu.matmul %14, %13, %cst_15 {dimension_numbers = #tpu.dot_dimension_numbers<[1], [0], [0], [1], [0, 0, 1, 1], [], []>} : vector<2x32xf32>, vector<32x128xf32>, vector<2x128xf32> -> vector<2x128xf32>
    %18 = arith.addf %16, %17 : vector<2x128xf32>
    %19 = vector.extract_strided_slice %18 {offsets = [0, 0], sizes = [2, 32], strides = [1, 1]} : vector<2x128xf32> to vector<2x32xf32>
    %20 = arith.negf %19 : vector<2x32xf32>
    %21 = math.exp %20 : vector<2x32xf32>
    %cst_16 = arith.constant 1.000000e+00 : f32
    %22 = vector.broadcast %cst_16 : f32 to vector<2x32xf32>
    %23 = arith.addf %22, %21 : vector<2x32xf32>
    %24 = arith.divf %22, %23 : vector<2x32xf32>
    %25 = vector.extract_strided_slice %18 {offsets = [0, 32], sizes = [2, 32], strides = [1, 1]} : vector<2x128xf32> to vector<2x32xf32>
    %26 = arith.negf %25 : vector<2x32xf32>
    %27 = math.exp %26 : vector<2x32xf32>
    %cst_17 = arith.constant 1.000000e+00 : f32
    %28 = vector.broadcast %cst_17 : f32 to vector<2x32xf32>
    %29 = arith.addf %28, %27 : vector<2x32xf32>
    %30 = arith.divf %28, %29 : vector<2x32xf32>
    %31 = vector.extract_strided_slice %18 {offsets = [0, 64], sizes = [2, 32], strides = [1, 1]} : vector<2x128xf32> to vector<2x32xf32>
    %32 = math.tanh %31 : vector<2x32xf32>
    %33 = vector.extract_strided_slice %18 {offsets = [0, 96], sizes = [2, 32], strides = [1, 1]} : vector<2x128xf32> to vector<2x32xf32>
    %34 = arith.negf %33 : vector<2x32xf32>
    %35 = math.exp %34 : vector<2x32xf32>
    %cst_18 = arith.constant 1.000000e+00 : f32
    %36 = vector.broadcast %cst_18 : f32 to vector<2x32xf32>
    %37 = arith.addf %36, %35 : vector<2x32xf32>
    %38 = arith.divf %36, %37 : vector<2x32xf32>
    %39 = arith.mulf %30, %15 : vector<2x32xf32>
    %40 = arith.mulf %24, %32 : vector<2x32xf32>
    %41 = arith.addf %39, %40 : vector<2x32xf32>
    %42 = math.tanh %41 : vector<2x32xf32>
    %43 = arith.mulf %38, %42 : vector<2x32xf32>
    %c0_19 = arith.constant 0 : index
    %c0_20 = arith.constant 0 : index
    %44 = vector.load %arg12[%c0_19, %c0_20] : memref<16x32xf32, #tpu.memory_space<vmem>>, vector<2x32xf32>
    tpu.vector_store %arg12[%c0_19, %c0_20], %43 {strides = array<i32>} : memref<16x32xf32, #tpu.memory_space<vmem>>, vector<2x32xf32>,
    %45 = vector.extract_strided_slice %12 {offsets = [2, 0], sizes = [2, 128], strides = [1, 1]} : vector<16x128xf32> to vector<2x128xf32>
    %cst_21 = arith.constant dense<0.000000e+00> : vector<2x128xf32>
    %46 = tpu.matmul %43, %13, %cst_21 {dimension_numbers = #tpu.dot_dimension_numbers<[1], [0], [0], [1], [0, 0, 1, 1], [], []>} : vector<2x32xf32>, vector<32x128xf32>, vector<2x128xf32> -> vector<2x128xf32>
    %47 = arith.addf %45, %46 : vector<2x128xf32>
    %48 = vector.extract_strided_slice %47 {offsets = [0, 0], sizes = [2, 32], strides = [1, 1]} : vector<2x128xf32> to vector<2x32xf32>
    %49 = arith.negf %48 : vector<2x32xf32>
    %50 = math.exp %49 : vector<2x32xf32>
    %cst_22 = arith.constant 1.000000e+00 : f32
    %51 = vector.broadcast %cst_22 : f32 to vector<2x32xf32>
    %52 = arith.addf %51, %50 : vector<2x32xf32>
    %53 = arith.divf %51, %52 : vector<2x32xf32>
    %54 = vector.extract_strided_slice %47 {offsets = [0, 32], sizes = [2, 32], strides = [1, 1]} : vector<2x128xf32> to vector<2x32xf32>
    %55 = arith.negf %54 : vector<2x32xf32>
    %56 = math.exp %55 : vector<2x32xf32>
    %cst_23 = arith.constant 1.000000e+00 : f32
    %57 = vector.broadcast %cst_23 : f32 to vector<2x32xf32>
    %58 = arith.addf %57, %56 : vector<2x32xf32>
    %59 = arith.divf %57, %58 : vector<2x32xf32>
    %60 = vector.extract_strided_slice %47 {offsets = [0, 64], sizes = [2, 32], strides = [1, 1]} : vector<2x128xf32> to vector<2x32xf32>
    %61 = math.tanh %60 : vector<2x32xf32>
    %62 = vector.extract_strided_slice %47 {offsets = [0, 96], sizes = [2, 32], strides = [1, 1]} : vector<2x128xf32> to vector<2x32xf32>
    %63 = arith.negf %62 : vector<2x32xf32>
    %64 = math.exp %63 : vector<2x32xf32>
    %cst_24 = arith.constant 1.000000e+00 : f32
    %65 = vector.broadcast %cst_24 : f32 to vector<2x32xf32>
    %66 = arith.addf %65, %64 : vector<2x32xf32>
    %67 = arith.divf %65, %66 : vector<2x32xf32>
    %68 = arith.mulf %59, %41 : vector<2x32xf32>
    %69 = arith.mulf %53, %61 : vector<2x32xf32>
    %70 = arith.addf %68, %69 : vector<2x32xf32>
    %71 = math.tanh %70 : vector<2x32xf32>
    %72 = arith.mulf %67, %71 : vector<2x32xf32>
    %c2 = arith.constant 2 : index
    %c0_25 = arith.constant 0 : index
    %73 = vector.load %arg12[%c2, %c0_25] : memref<16x32xf32, #tpu.memory_space<vmem>>, vector<2x32xf32>
    tpu.vector_store %arg12[%c2, %c0_25], %72 {strides = array<i32>} : memref<16x32xf32, #tpu.memory_space<vmem>>, vector<2x32xf32>,
    %74 = vector.extract_strided_slice %12 {offsets = [4, 0], sizes = [2, 128], strides = [1, 1]} : vector<16x128xf32> to vector<2x128xf32>
    %cst_26 = arith.constant dense<0.000000e+00> : vector<2x128xf32>
    %75 = tpu.matmul %72, %13, %cst_26 {dimension_numbers = #tpu.dot_dimension_numbers<[1], [0], [0], [1], [0, 0, 1, 1], [], []>} : vector<2x32xf32>, vector<32x128xf32>, vector<2x128xf32> -> vector<2x128xf32>
    %76 = arith.addf %74, %75 : vector<2x128xf32>
    %77 = vector.extract_strided_slice %76 {offsets = [0, 0], sizes = [2, 32], strides = [1, 1]} : vector<2x128xf32> to vector<2x32xf32>
    %78 = arith.negf %77 : vector<2x32xf32>
    %79 = math.exp %78 : vector<2x32xf32>
    %cst_27 = arith.constant 1.000000e+00 : f32
    %80 = vector.broadcast %cst_27 : f32 to vector<2x32xf32>
    %81 = arith.addf %80, %79 : vector<2x32xf32>
    %82 = arith.divf %80, %81 : vector<2x32xf32>
    %83 = vector.extract_strided_slice %76 {offsets = [0, 32], sizes = [2, 32], strides = [1, 1]} : vector<2x128xf32> to vector<2x32xf32>
    %84 = arith.negf %83 : vector<2x32xf32>
    %85 = math.exp %84 : vector<2x32xf32>
    %cst_28 = arith.constant 1.000000e+00 : f32
    %86 = vector.broadcast %cst_28 : f32 to vector<2x32xf32>
    %87 = arith.addf %86, %85 : vector<2x32xf32>
    %88 = arith.divf %86, %87 : vector<2x32xf32>
    %89 = vector.extract_strided_slice %76 {offsets = [0, 64], sizes = [2, 32], strides = [1, 1]} : vector<2x128xf32> to vector<2x32xf32>
    %90 = math.tanh %89 : vector<2x32xf32>
    %91 = vector.extract_strided_slice %76 {offsets = [0, 96], sizes = [2, 32], strides = [1, 1]} : vector<2x128xf32> to vector<2x32xf32>
    %92 = arith.negf %91 : vector<2x32xf32>
    %93 = math.exp %92 : vector<2x32xf32>
    %cst_29 = arith.constant 1.000000e+00 : f32
    %94 = vector.broadcast %cst_29 : f32 to vector<2x32xf32>
    %95 = arith.addf %94, %93 : vector<2x32xf32>
    %96 = arith.divf %94, %95 : vector<2x32xf32>
    %97 = arith.mulf %88, %70 : vector<2x32xf32>
    %98 = arith.mulf %82, %90 : vector<2x32xf32>
    %99 = arith.addf %97, %98 : vector<2x32xf32>
    %100 = math.tanh %99 : vector<2x32xf32>
    %101 = arith.mulf %96, %100 : vector<2x32xf32>
    %c4 = arith.constant 4 : index
    %c0_30 = arith.constant 0 : index
    %102 = vector.load %arg12[%c4, %c0_30] : memref<16x32xf32, #tpu.memory_space<vmem>>, vector<2x32xf32>
    tpu.vector_store %arg12[%c4, %c0_30], %101 {strides = array<i32>} : memref<16x32xf32, #tpu.memory_space<vmem>>, vector<2x32xf32>,
    %103 = vector.extract_strided_slice %12 {offsets = [6, 0], sizes = [2, 128], strides = [1, 1]} : vector<16x128xf32> to vector<2x128xf32>
    %cst_31 = arith.constant dense<0.000000e+00> : vector<2x128xf32>
    %104 = tpu.matmul %101, %13, %cst_31 {dimension_numbers = #tpu.dot_dimension_numbers<[1], [0], [0], [1], [0, 0, 1, 1], [], []>} : vector<2x32xf32>, vector<32x128xf32>, vector<2x128xf32> -> vector<2x128xf32>
    %105 = arith.addf %103, %104 : vector<2x128xf32>
    %106 = vector.extract_strided_slice %105 {offsets = [0, 0], sizes = [2, 32], strides = [1, 1]} : vector<2x128xf32> to vector<2x32xf32>
    %107 = arith.negf %106 : vector<2x32xf32>
    %108 = math.exp %107 : vector<2x32xf32>
    %cst_32 = arith.constant 1.000000e+00 : f32
    %109 = vector.broadcast %cst_32 : f32 to vector<2x32xf32>
    %110 = arith.addf %109, %108 : vector<2x32xf32>
    %111 = arith.divf %109, %110 : vector<2x32xf32>
    %112 = vector.extract_strided_slice %105 {offsets = [0, 32], sizes = [2, 32], strides = [1, 1]} : vector<2x128xf32> to vector<2x32xf32>
    %113 = arith.negf %112 : vector<2x32xf32>
    %114 = math.exp %113 : vector<2x32xf32>
    %cst_33 = arith.constant 1.000000e+00 : f32
    %115 = vector.broadcast %cst_33 : f32 to vector<2x32xf32>
    %116 = arith.addf %115, %114 : vector<2x32xf32>
    %117 = arith.divf %115, %116 : vector<2x32xf32>
    %118 = vector.extract_strided_slice %105 {offsets = [0, 64], sizes = [2, 32], strides = [1, 1]} : vector<2x128xf32> to vector<2x32xf32>
    %119 = math.tanh %118 : vector<2x32xf32>
    %120 = vector.extract_strided_slice %105 {offsets = [0, 96], sizes = [2, 32], strides = [1, 1]} : vector<2x128xf32> to vector<2x32xf32>
    %121 = arith.negf %120 : vector<2x32xf32>
    %122 = math.exp %121 : vector<2x32xf32>
    %cst_34 = arith.constant 1.000000e+00 : f32
    %123 = vector.broadcast %cst_34 : f32 to vector<2x32xf32>
    %124 = arith.addf %123, %122 : vector<2x32xf32>
    %125 = arith.divf %123, %124 : vector<2x32xf32>
    %126 = arith.mulf %117, %99 : vector<2x32xf32>
    %127 = arith.mulf %111, %119 : vector<2x32xf32>
    %128 = arith.addf %126, %127 : vector<2x32xf32>
    %129 = math.tanh %128 : vector<2x32xf32>
    %130 = arith.mulf %125, %129 : vector<2x32xf32>
    %c6 = arith.constant 6 : index
    %c0_35 = arith.constant 0 : index
    %131 = vector.load %arg12[%c6, %c0_35] : memref<16x32xf32, #tpu.memory_space<vmem>>, vector<2x32xf32>
    tpu.vector_store %arg12[%c6, %c0_35], %130 {strides = array<i32>} : memref<16x32xf32, #tpu.memory_space<vmem>>, vector<2x32xf32>,
    %132 = vector.extract_strided_slice %12 {offsets = [8, 0], sizes = [2, 128], strides = [1, 1]} : vector<16x128xf32> to vector<2x128xf32>
    %cst_36 = arith.constant dense<0.000000e+00> : vector<2x128xf32>
    %133 = tpu.matmul %130, %13, %cst_36 {dimension_numbers = #tpu.dot_dimension_numbers<[1], [0], [0], [1], [0, 0, 1, 1], [], []>} : vector<2x32xf32>, vector<32x128xf32>, vector<2x128xf32> -> vector<2x128xf32>
    %134 = arith.addf %132, %133 : vector<2x128xf32>
    %135 = vector.extract_strided_slice %134 {offsets = [0, 0], sizes = [2, 32], strides = [1, 1]} : vector<2x128xf32> to vector<2x32xf32>
    %136 = arith.negf %135 : vector<2x32xf32>
    %137 = math.exp %136 : vector<2x32xf32>
    %cst_37 = arith.constant 1.000000e+00 : f32
    %138 = vector.broadcast %cst_37 : f32 to vector<2x32xf32>
    %139 = arith.addf %138, %137 : vector<2x32xf32>
    %140 = arith.divf %138, %139 : vector<2x32xf32>
    %141 = vector.extract_strided_slice %134 {offsets = [0, 32], sizes = [2, 32], strides = [1, 1]} : vector<2x128xf32> to vector<2x32xf32>
    %142 = arith.negf %141 : vector<2x32xf32>
    %143 = math.exp %142 : vector<2x32xf32>
    %cst_38 = arith.constant 1.000000e+00 : f32
    %144 = vector.broadcast %cst_38 : f32 to vector<2x32xf32>
    %145 = arith.addf %144, %143 : vector<2x32xf32>
    %146 = arith.divf %144, %145 : vector<2x32xf32>
    %147 = vector.extract_strided_slice %134 {offsets = [0, 64], sizes = [2, 32], strides = [1, 1]} : vector<2x128xf32> to vector<2x32xf32>
    %148 = math.tanh %147 : vector<2x32xf32>
    %149 = vector.extract_strided_slice %134 {offsets = [0, 96], sizes = [2, 32], strides = [1, 1]} : vector<2x128xf32> to vector<2x32xf32>
    %150 = arith.negf %149 : vector<2x32xf32>
    %151 = math.exp %150 : vector<2x32xf32>
    %cst_39 = arith.constant 1.000000e+00 : f32
    %152 = vector.broadcast %cst_39 : f32 to vector<2x32xf32>
    %153 = arith.addf %152, %151 : vector<2x32xf32>
    %154 = arith.divf %152, %153 : vector<2x32xf32>
    %155 = arith.mulf %146, %128 : vector<2x32xf32>
    %156 = arith.mulf %140, %148 : vector<2x32xf32>
    %157 = arith.addf %155, %156 : vector<2x32xf32>
    %158 = math.tanh %157 : vector<2x32xf32>
    %159 = arith.mulf %154, %158 : vector<2x32xf32>
    %c8 = arith.constant 8 : index
    %c0_40 = arith.constant 0 : index
    %160 = vector.load %arg12[%c8, %c0_40] : memref<16x32xf32, #tpu.memory_space<vmem>>, vector<2x32xf32>
    tpu.vector_store %arg12[%c8, %c0_40], %159 {strides = array<i32>} : memref<16x32xf32, #tpu.memory_space<vmem>>, vector<2x32xf32>,
    %161 = vector.extract_strided_slice %12 {offsets = [10, 0], sizes = [2, 128], strides = [1, 1]} : vector<16x128xf32> to vector<2x128xf32>
    %cst_41 = arith.constant dense<0.000000e+00> : vector<2x128xf32>
    %162 = tpu.matmul %159, %13, %cst_41 {dimension_numbers = #tpu.dot_dimension_numbers<[1], [0], [0], [1], [0, 0, 1, 1], [], []>} : vector<2x32xf32>, vector<32x128xf32>, vector<2x128xf32> -> vector<2x128xf32>
    %163 = arith.addf %161, %162 : vector<2x128xf32>
    %164 = vector.extract_strided_slice %163 {offsets = [0, 0], sizes = [2, 32], strides = [1, 1]} : vector<2x128xf32> to vector<2x32xf32>
    %165 = arith.negf %164 : vector<2x32xf32>
    %166 = math.exp %165 : vector<2x32xf32>
    %cst_42 = arith.constant 1.000000e+00 : f32
    %167 = vector.broadcast %cst_42 : f32 to vector<2x32xf32>
    %168 = arith.addf %167, %166 : vector<2x32xf32>
    %169 = arith.divf %167, %168 : vector<2x32xf32>
    %170 = vector.extract_strided_slice %163 {offsets = [0, 32], sizes = [2, 32], strides = [1, 1]} : vector<2x128xf32> to vector<2x32xf32>
    %171 = arith.negf %170 : vector<2x32xf32>
    %172 = math.exp %171 : vector<2x32xf32>
    %cst_43 = arith.constant 1.000000e+00 : f32
    %173 = vector.broadcast %cst_43 : f32 to vector<2x32xf32>
    %174 = arith.addf %173, %172 : vector<2x32xf32>
    %175 = arith.divf %173, %174 : vector<2x32xf32>
    %176 = vector.extract_strided_slice %163 {offsets = [0, 64], sizes = [2, 32], strides = [1, 1]} : vector<2x128xf32> to vector<2x32xf32>
    %177 = math.tanh %176 : vector<2x32xf32>
    %178 = vector.extract_strided_slice %163 {offsets = [0, 96], sizes = [2, 32], strides = [1, 1]} : vector<2x128xf32> to vector<2x32xf32>
    %179 = arith.negf %178 : vector<2x32xf32>
    %180 = math.exp %179 : vector<2x32xf32>
    %cst_44 = arith.constant 1.000000e+00 : f32
    %181 = vector.broadcast %cst_44 : f32 to vector<2x32xf32>
    %182 = arith.addf %181, %180 : vector<2x32xf32>
    %183 = arith.divf %181, %182 : vector<2x32xf32>
    %184 = arith.mulf %175, %157 : vector<2x32xf32>
    %185 = arith.mulf %169, %177 : vector<2x32xf32>
    %186 = arith.addf %184, %185 : vector<2x32xf32>
    %187 = math.tanh %186 : vector<2x32xf32>
    %188 = arith.mulf %183, %187 : vector<2x32xf32>
    %c10 = arith.constant 10 : index
    %c0_45 = arith.constant 0 : index
    %189 = vector.load %arg12[%c10, %c0_45] : memref<16x32xf32, #tpu.memory_space<vmem>>, vector<2x32xf32>
    tpu.vector_store %arg12[%c10, %c0_45], %188 {strides = array<i32>} : memref<16x32xf32, #tpu.memory_space<vmem>>, vector<2x32xf32>,
    %190 = vector.extract_strided_slice %12 {offsets = [12, 0], sizes = [2, 128], strides = [1, 1]} : vector<16x128xf32> to vector<2x128xf32>
    %cst_46 = arith.constant dense<0.000000e+00> : vector<2x128xf32>
    %191 = tpu.matmul %188, %13, %cst_46 {dimension_numbers = #tpu.dot_dimension_numbers<[1], [0], [0], [1], [0, 0, 1, 1], [], []>} : vector<2x32xf32>, vector<32x128xf32>, vector<2x128xf32> -> vector<2x128xf32>
    %192 = arith.addf %190, %191 : vector<2x128xf32>
    %193 = vector.extract_strided_slice %192 {offsets = [0, 0], sizes = [2, 32], strides = [1, 1]} : vector<2x128xf32> to vector<2x32xf32>
    %194 = arith.negf %193 : vector<2x32xf32>
    %195 = math.exp %194 : vector<2x32xf32>
    %cst_47 = arith.constant 1.000000e+00 : f32
    %196 = vector.broadcast %cst_47 : f32 to vector<2x32xf32>
    %197 = arith.addf %196, %195 : vector<2x32xf32>
    %198 = arith.divf %196, %197 : vector<2x32xf32>
    %199 = vector.extract_strided_slice %192 {offsets = [0, 32], sizes = [2, 32], strides = [1, 1]} : vector<2x128xf32> to vector<2x32xf32>
    %200 = arith.negf %199 : vector<2x32xf32>
    %201 = math.exp %200 : vector<2x32xf32>
    %cst_48 = arith.constant 1.000000e+00 : f32
    %202 = vector.broadcast %cst_48 : f32 to vector<2x32xf32>
    %203 = arith.addf %202, %201 : vector<2x32xf32>
    %204 = arith.divf %202, %203 : vector<2x32xf32>
    %205 = vector.extract_strided_slice %192 {offsets = [0, 64], sizes = [2, 32], strides = [1, 1]} : vector<2x128xf32> to vector<2x32xf32>
    %206 = math.tanh %205 : vector<2x32xf32>
    %207 = vector.extract_strided_slice %192 {offsets = [0, 96], sizes = [2, 32], strides = [1, 1]} : vector<2x128xf32> to vector<2x32xf32>
    %208 = arith.negf %207 : vector<2x32xf32>
    %209 = math.exp %208 : vector<2x32xf32>
    %cst_49 = arith.constant 1.000000e+00 : f32
    %210 = vector.broadcast %cst_49 : f32 to vector<2x32xf32>
    %211 = arith.addf %210, %209 : vector<2x32xf32>
    %212 = arith.divf %210, %211 : vector<2x32xf32>
    %213 = arith.mulf %204, %186 : vector<2x32xf32>
    %214 = arith.mulf %198, %206 : vector<2x32xf32>
    %215 = arith.addf %213, %214 : vector<2x32xf32>
    %216 = math.tanh %215 : vector<2x32xf32>
    %217 = arith.mulf %212, %216 : vector<2x32xf32>
    %c12 = arith.constant 12 : index
    %c0_50 = arith.constant 0 : index
    %218 = vector.load %arg12[%c12, %c0_50] : memref<16x32xf32, #tpu.memory_space<vmem>>, vector<2x32xf32>
    tpu.vector_store %arg12[%c12, %c0_50], %217 {strides = array<i32>} : memref<16x32xf32, #tpu.memory_space<vmem>>, vector<2x32xf32>,
    %219 = vector.extract_strided_slice %12 {offsets = [14, 0], sizes = [2, 128], strides = [1, 1]} : vector<16x128xf32> to vector<2x128xf32>
    %cst_51 = arith.constant dense<0.000000e+00> : vector<2x128xf32>
    %220 = tpu.matmul %217, %13, %cst_51 {dimension_numbers = #tpu.dot_dimension_numbers<[1], [0], [0], [1], [0, 0, 1, 1], [], []>} : vector<2x32xf32>, vector<32x128xf32>, vector<2x128xf32> -> vector<2x128xf32>
    %221 = arith.addf %219, %220 : vector<2x128xf32>
    %222 = vector.extract_strided_slice %221 {offsets = [0, 0], sizes = [2, 32], strides = [1, 1]} : vector<2x128xf32> to vector<2x32xf32>
    %223 = arith.negf %222 : vector<2x32xf32>
    %224 = math.exp %223 : vector<2x32xf32>
    %cst_52 = arith.constant 1.000000e+00 : f32
    %225 = vector.broadcast %cst_52 : f32 to vector<2x32xf32>
    %226 = arith.addf %225, %224 : vector<2x32xf32>
    %227 = arith.divf %225, %226 : vector<2x32xf32>
    %228 = vector.extract_strided_slice %221 {offsets = [0, 32], sizes = [2, 32], strides = [1, 1]} : vector<2x128xf32> to vector<2x32xf32>
    %229 = arith.negf %228 : vector<2x32xf32>
    %230 = math.exp %229 : vector<2x32xf32>
    %cst_53 = arith.constant 1.000000e+00 : f32
    %231 = vector.broadcast %cst_53 : f32 to vector<2x32xf32>
    %232 = arith.addf %231, %230 : vector<2x32xf32>
    %233 = arith.divf %231, %232 : vector<2x32xf32>
    %234 = vector.extract_strided_slice %221 {offsets = [0, 64], sizes = [2, 32], strides = [1, 1]} : vector<2x128xf32> to vector<2x32xf32>
    %235 = math.tanh %234 : vector<2x32xf32>
    %236 = vector.extract_strided_slice %221 {offsets = [0, 96], sizes = [2, 32], strides = [1, 1]} : vector<2x128xf32> to vector<2x32xf32>
    %237 = arith.negf %236 : vector<2x32xf32>
    %238 = math.exp %237 : vector<2x32xf32>
    %cst_54 = arith.constant 1.000000e+00 : f32
    %239 = vector.broadcast %cst_54 : f32 to vector<2x32xf32>
    %240 = arith.addf %239, %238 : vector<2x32xf32>
    %241 = arith.divf %239, %240 : vector<2x32xf32>
    %242 = arith.mulf %233, %215 : vector<2x32xf32>
    %243 = arith.mulf %227, %235 : vector<2x32xf32>
    %244 = arith.addf %242, %243 : vector<2x32xf32>
    %245 = math.tanh %244 : vector<2x32xf32>
    %246 = arith.mulf %241, %245 : vector<2x32xf32>
    %c14 = arith.constant 14 : index
    %c0_55 = arith.constant 0 : index
    %247 = vector.load %arg12[%c14, %c0_55] : memref<16x32xf32, #tpu.memory_space<vmem>>, vector<2x32xf32>
    tpu.vector_store %arg12[%c14, %c0_55], %246 {strides = array<i32>} : memref<16x32xf32, #tpu.memory_space<vmem>>, vector<2x32xf32>,
    %c0_56 = arith.constant 0 : index
    %c0_57 = arith.constant 0 : index
    %248 = vector.load %arg12[%c0_56, %c0_57] : memref<16x32xf32, #tpu.memory_space<vmem>>, vector<16x32xf32>
    %c0_58 = arith.constant 0 : index
    %c0_59 = arith.constant 0 : index
    %249 = vector.load %arg7[%c0_58, %c0_59] : memref<1x32xf32, #tpu.memory_space<vmem>>, vector<1x32xf32>
    %250 = vector.broadcast %249 : vector<1x32xf32> to vector<16x32xf32>
    %251 = arith.mulf %248, %250 : vector<16x32xf32>
    %cst_60 = arith.constant dense<0.000000e+00> : vector<16xf32>
    %252 = vector.multi_reduction <add>, %251, %cst_60 [1] : vector<16x32xf32> to vector<16xf32>
    %253 = vector.shape_cast %252 : vector<16xf32> to vector<16x1xf32>
    %c0_61 = arith.constant 0 : index
    %c0_62 = arith.constant 0 : index
    %254 = vector.load %arg8[%c0_61, %c0_62] : memref<1x1xf32, #tpu.memory_space<vmem>>, vector<1x1xf32>
    %255 = vector.broadcast %254 : vector<1x1xf32> to vector<16x1xf32>
    %256 = arith.addf %253, %255 : vector<16x1xf32>
    %c0_63 = arith.constant 0 : index
    %c0_64 = arith.constant 0 : index
    %257 = vector.load %arg9[%c0_63, %c0_64] : memref<16x1xf32, #tpu.memory_space<vmem>>, vector<16x1xf32>
    tpu.vector_store %arg9[%c0_63, %c0_64], %256 {strides = array<i32>} : memref<16x1xf32, #tpu.memory_space<vmem>>, vector<16x1xf32>,
    %c0_65 = arith.constant 0 : index
    %c0_66 = arith.constant 0 : index
    %258 = vector.load %arg10[%c0_65, %c0_66] : memref<2x32xf32, #tpu.memory_space<vmem>>, vector<2x32xf32>
    tpu.vector_store %arg10[%c0_65, %c0_66], %246 {strides = array<i32>} : memref<2x32xf32, #tpu.memory_space<vmem>>, vector<2x32xf32>,
    %c0_67 = arith.constant 0 : index
    %c0_68 = arith.constant 0 : index
    %259 = vector.load %arg11[%c0_67, %c0_68] : memref<2x32xf32, #tpu.memory_space<vmem>>, vector<2x32xf32>
    tpu.vector_store %arg11[%c0_67, %c0_68], %244 {strides = array<i32>} : memref<2x32xf32, #tpu.memory_space<vmem>>, vector<2x32xf32>,
    return
  }
  func.func @transform_0(%arg0: i32) -> (i32, i32) {
    %c0_i32 = arith.constant 0 : i32
    %c0_i32_0 = arith.constant 0 : i32
    %c0_i32_1 = arith.constant 0 : i32
    return %c0_i32, %c0_i32_0 : i32, i32
  }
  func.func @transform_1(%arg0: i32) -> (i32, i32) {
    %c0_i32 = arith.constant 0 : i32
    %c0_i32_0 = arith.constant 0 : i32
    %c0_i32_1 = arith.constant 0 : i32
    return %c0_i32, %c0_i32_0 : i32, i32
  }
  func.func @transform_2(%arg0: i32) -> (i32, i32) {
    %c0_i32 = arith.constant 0 : i32
    %c0_i32_0 = arith.constant 0 : i32
    %c0_i32_1 = arith.constant 0 : i32
    return %c0_i32, %c0_i32_0 : i32, i32
  }
  func.func @transform_3(%arg0: i32) -> (i32, i32) {
    %c0_i32 = arith.constant 0 : i32
    %c0_i32_0 = arith.constant 0 : i32
    %c0_i32_1 = arith.constant 0 : i32
    return %c0_i32, %c0_i32_0 : i32, i32
  }
  func.func @transform_4(%arg0: i32) -> (i32, i32) {
    %c0_i32 = arith.constant 0 : i32
    %c0_i32_0 = arith.constant 0 : i32
    %c0_i32_1 = arith.constant 0 : i32
    return %c0_i32, %c0_i32_0 : i32, i32
  }
  func.func @transform_5(%arg0: i32) -> (i32, i32) {
    %c0_i32 = arith.constant 0 : i32
    %c0_i32_0 = arith.constant 0 : i32
    %c0_i32_1 = arith.constant 0 : i32
    return %c0_i32, %c0_i32_0 : i32, i32
  }
  func.func @transform_6(%arg0: i32) -> (i32, i32) {
    %c0_i32 = arith.constant 0 : i32
    %c0_i32_0 = arith.constant 0 : i32
    %c0_i32_1 = arith.constant 0 : i32
    return %c0_i32, %c0_i32_0 : i32, i32
  }
  func.func @transform_7(%arg0: i32) -> (i32, i32) {
    %c0_i32 = arith.constant 0 : i32
    %c0_i32_0 = arith.constant 0 : i32
    %c0_i32_1 = arith.constant 0 : i32
    return %c0_i32, %c0_i32_0 : i32, i32
  }
  func.func @transform_8(%arg0: i32) -> (i32, i32) {
    %c0_i32 = arith.constant 0 : i32
    %c0_i32_0 = arith.constant 0 : i32
    %c0_i32_1 = arith.constant 0 : i32
    return %c0_i32, %c0_i32_0 : i32, i32
  }
  func.func @transform_9(%arg0: i32) -> (i32, i32) {
    %c0_i32 = arith.constant 0 : i32
    %c0_i32_0 = arith.constant 0 : i32
    %c0_i32_1 = arith.constant 0 : i32
    return %c0_i32, %c0_i32_0 : i32, i32
  }
  func.func @transform_10(%arg0: i32) -> (i32, i32) {
    %c0_i32 = arith.constant 0 : i32
    %c0_i32_0 = arith.constant 0 : i32
    %c0_i32_1 = arith.constant 0 : i32
    return %c0_i32, %c0_i32_0 : i32, i32
  }
}

</mosaic_0001>

<bundles_post_ra>
// kernel: tpu_custom_call.1
= control target key start
LH: loop header
LB: loop body
LE: loop exit
PB: predicated region body
PF: predicated region fallthrough
CT: control target
= control target key end

     0   :  { %s2009_s0 = inlined_call_operand.hbm [shape: f32[16,16], index: 0, kind: input, shape index: {}]   ;;  %s2010_s1 = inlined_call_operand.hbm [shape: f32[16,32], index: 1, kind: input, shape index: {}]   ;;  %s2011_s2 = inlined_call_operand.vmem [shape: f32[1,32], index: 2, kind: input, shape index: {}]   ;;  %s2012_s3 = inlined_call_operand.hbm [shape: f32[32,128], index: 3, kind: input, shape index: {}]   ;;  %s2013_s4 = inlined_call_operand.hbm [shape: f32[32,128], index: 4, kind: input, shape index: {}]   ;;  %s2014_s5 = inlined_call_operand.vmem [shape: f32[1,128], index: 5, kind: input, shape index: {}]   ;;  %s2015_s6 = inlined_call_operand.vmem [shape: f32[1,32], index: 6, kind: input, shape index: {}]   ;;  %s2016_s7 = inlined_call_operand.<no memory space> [shape: f32[1,1], index: 7, kind: input, shape index: {}]   ;;  %s2017_s8 = inlined_call_operand.vmem [shape: f32[16,1], index: 8, kind: output, shape index: {0}]   ;;  %s2018_s9 = inlined_call_operand.hbm [shape: f32[2,32], index: 9, kind: output, shape index: {1}]   ;;  %s2019_s10 = inlined_call_operand.hbm [shape: f32[2,32], index: 10, kind: output, shape index: {2}]  }
   0x1   :  { %v16_v0 = vstv %s2016_s7 }
   0x2   :  { %17 = vst [vmem:[#allocation3] sm:$0x1] %v16_v0 }
   0x3   :  { %18 = vsyncpa [#allocation5], 0 }
   0x4   :  { %19 = vsyncpa [#allocation8], 0 }
   0x5   :  { %20 = vsyncpa [#allocation11], 0 }
   0x6   :  { %21 = vsyncpa [#allocation6], 0 }
   0x7   :  { %22 = vsyncpa [#allocation14], 0  ;;  %s1687_s15 = smov [#allocation7]   ;;  %s1688_s17 = smov [#allocation4]  }
   0x8   :  { %s40_s16 = sshll.u32 %s1687_s15, 4  ;;  %s28_s18 = sshll.u32 %s1688_s17, 4  ;;  %s41_s16 = int_to_ptr.vmem [resolvable:$true] %s40_s16  ;;  %s1759_s18 = int_to_ptr.vmem [resolvable:$true] %s28_s18 }
   0x9   :  { %s1545_s21 = scalar_lea.hbm %s2010_s1, 256 }
   0xa   :  { %p1546_p0 = scmp.ne.s32.totalorder %s2010_s1, %s1545_s21  ;;  %p1549_p1 = scmp.lt.u32.totalorder %s1545_s21, %s2010_s1 }
   0xc   :  { %p1551_p2 = pnand %p1549_p1, %p1546_p0 }
   0xe   :  { %1554 = shalt.err (!%p1551_p2)
}
   0xf   :  { %s1555_s25 = scalar_lea.vmem %s41_s16, 256  ;;  %p1560_p4 = scmp.lt.s32.totalorder %s41_s16, %s41_s16 }
  0x10   :  { %p1556_p3 = scmp.ne.s32.totalorder %s41_s16, %s1555_s25  ;;  %p1561_p5 = scmp.lt.s32.totalorder %s1555_s25, %s1555_s25 }
  0x12   :  { %p1562_p6 = por %p1561_p5, %p1560_p4 }
  0x14   :  { %p1563_p7 = pnand %p1562_p6, %p1556_p3 }
  0x16   :  { %1566 = shalt.err (!%p1563_p7)
}
  0x17   :  { %s1689_s26 = smov 128   ;;  %s1690_s27 = smov 8  }
  0x18   :  { %46 = dma.hbm_to_vmem [thread:$0]  %s2010_s1, 256, %s41_s16, [#allocation8], %s1689_s26, %s1689_s26, %s1690_s27  }
  0x19   :  { %s1567_s12 = scalar_lea.hbm %s2009_s0, 256 }
  0x1a   :  { %p1568_p8 = scmp.ne.s32.totalorder %s2009_s0, %s1567_s12  ;;  %p1571_p9 = scmp.lt.u32.totalorder %s1567_s12, %s2009_s0 }
  0x1c   :  { %p1573_p10 = pnand %p1571_p9, %p1568_p8 }
  0x1e   :  { %1576 = shalt.err (!%p1573_p10)
}
  0x1f   :  { %s1577_s19 = scalar_lea.vmem %s1759_s18, 256  ;;  %p1582_p12 = scmp.lt.s32.totalorder %s1759_s18, %s1759_s18 }
  0x20   :  { %p1578_p11 = scmp.ne.s32.totalorder %s1759_s18, %s1577_s19  ;;  %p1583_p13 = scmp.lt.s32.totalorder %s1577_s19, %s1577_s19 }
  0x22   :  { %p1584_p0 = por %p1583_p13, %p1582_p12 }
  0x24   :  { %p1585_p1 = pnand %p1584_p0, %p1578_p11 }
  0x26   :  { %1588 = shalt.err (!%p1585_p1)
}
  0x27   :  { %34 = dma.hbm_to_vmem [thread:$0]  %s2009_s0, 256, %s1759_s18, [#allocation5], %s1689_s26, %s1689_s26, %s1690_s27  }
  0x28   :  { %s1691_s20 = smov [#allocation9]   ;;  %s1692_s22 = smov [#allocation10]  }
  0x29   :  { %s54_s21 = sshll.u32 %s1691_s20, 4  ;;  %s66_s23 = sshll.u32 %s1692_s22, 4  ;;  %s55_s21 = int_to_ptr.vmem [resolvable:$true] %s54_s21  ;;  %s1796_s23 = int_to_ptr.vmem [resolvable:$true] %s66_s23 }
  0x2a   :  { %s1589_s25 = scalar_lea.hbm %s2012_s3, 512 }
  0x2b   :  { %p1590_p2 = scmp.ne.s32.totalorder %s2012_s3, %s1589_s25  ;;  %p1593_p3 = scmp.lt.u32.totalorder %s1589_s25, %s2012_s3 }
  0x2d   :  { %p1595_p4 = pnand %p1593_p3, %p1590_p2 }
  0x2f   :  { %1598 = shalt.err (!%p1595_p4)
}
  0x30   :  { %s1599_s0 = scalar_lea.vmem %s55_s21, 512  ;;  %p1604_p6 = scmp.lt.s32.totalorder %s55_s21, %s55_s21 }
  0x31   :  { %p1600_p5 = scmp.ne.s32.totalorder %s55_s21, %s1599_s0  ;;  %p1605_p7 = scmp.lt.s32.totalorder %s1599_s0, %s1599_s0 }
  0x33   :  { %p1606_p8 = por %p1605_p7, %p1604_p6 }
  0x35   :  { %p1607_p9 = pnand %p1606_p8, %p1600_p5 }
  0x37   :  { %1610 = shalt.err (!%p1607_p9)
}
  0x38   :  { %60 = dma.hbm_to_vmem [thread:$0]  %s2012_s3, 512, %s55_s21, [#allocation8], %s1689_s26, %s1689_s26, %s1690_s27  }
  0x39   :  { %s1611_s15 = scalar_lea.hbm %s2013_s4, 512 }
  0x3a   :  { %p1612_p10 = scmp.ne.s32.totalorder %s2013_s4, %s1611_s15  ;;  %p1615_p11 = scmp.lt.u32.totalorder %s1611_s15, %s2013_s4 }
  0x3c   :  { %p1617_p12 = pnand %p1615_p11, %p1612_p10 }
  0x3e   :  { %1620 = shalt.err (!%p1617_p12)
}
  0x3f   :  { %s1621_s20 = scalar_lea.vmem %s1796_s23, 512  ;;  %p1626_p0 = scmp.lt.s32.totalorder %s1796_s23, %s1796_s23 }
  0x40   :  { %p1622_p13 = scmp.ne.s32.totalorder %s1796_s23, %s1621_s20  ;;  %p1627_p1 = scmp.lt.s32.totalorder %s1621_s20, %s1621_s20 }
  0x42   :  { %p1628_p2 = por %p1627_p1, %p1626_p0 }
  0x44   :  { %p1629_p3 = pnand %p1628_p2, %p1622_p13 }
  0x46   :  { %1632 = shalt.err (!%p1629_p3)
}
  0x47   :  { %72 = dma.hbm_to_vmem [thread:$0]  %s2013_s4, 512, %s1796_s23, [#allocation11], %s1689_s26, %s1689_s26, %s1690_s27  }
  0x48   :  { %1677 = dma.done.wait [#allocation5], 256  }
  0x49   :  { %1678 = vsyncadd [#allocation5], 4294967040 }
  0x4a   :  { %1679 = dma.done.wait [#allocation8], 768  }
  0x4b   :  { %1680 = vsyncadd [#allocation8], 4294966528 }
  0x4c   :  { %1681 = dma.done.wait [#allocation11], 512  }
  0x4d   :  { %1682 = vsyncadd [#allocation11], 4294966784  ;;  %vm102_vm0 = vcmask 130048   ;;  %v93_v1 = vld [vmem:[#allocation7] sm:$0xff]  ;;  %v94_v2 = vld [vmem:[#allocation7 + $0x8] sm:$0xff]  ;;  %v1693_v14 = vmov 0.0|0.0  }
  0x4e   :  { %v91_v3 = vld [vmem:[#allocation4] sm:$0xff]  ;;  %v1407_v4 = vpack.c.bf16 %v94_v2, %v93_v1  ;;  %v187_v6 = vld [vmem:[#allocation9 + $0x8] sm:$0xff]  ;;  %v188_v12 = vld [vmem:[#allocation9 + $0x10] sm:$0xff]  ;;  %vm1694_vm1 = vmmov 0   ;;  %v1695_v19 = vmov 0.0   ;;  %vm197_vm2 = vcmask 261120  }
  0x4f   :  { %1305 = vmatprep.mubr.msk.f32.mxu0 %vm102_vm0, %v91_v3  ;;  %v186_v5 = vld [vmem:[#allocation9] sm:$0xff]  ;;  %v92_v8 = vld [vmem:[#allocation4 + $0x8] sm:$0xff]  ;;  %v189_v13 = vld [vmem:[#allocation9 + $0x18] sm:$0xff]  ;;  %s1696_s22 = smov 64   ;;  %vm385_vm3 = vcmask 254976   ;;  %vm494_vm4 = vcmask 257026  }
  0x50   :  { %v1411_v7 = vpack.c.bf16 %v187_v6, %v186_v5  ;;  %1408 = vmatprep.subr.bf16.mxu0 %v1407_v4  ;;  %v279_v9 = vld [vmem:[#allocation10] sm:$0xff]  ;;  %v280_v10 = vld [vmem:[#allocation10 + $0x8] sm:$0xff]  ;;  %v1415_v15 = vpack.c.bf16 %v189_v13, %v188_v12  ;;  %v281_v16 = vld [vmem:[#allocation10 + $0x10] sm:$0xff]  ;;  %vm718_vm5 = vcmask 261126   ;;  %vm606_vm6 = vcmask 259076   ;;  %s1698_s24 = smov [#allocation12]  }
  0x51   :  { %1410 = vmatpush3.bf16.msra.mxu0 %v1407_v4  ;;  %v1833_v11 = vpack.c.bf16 %v280_v10, %v279_v9  ;;  %v282_v17 = vld [vmem:[#allocation10 + $0x18] sm:$0xff]  ;;  %v1228_v20 = vld [vmem:[%s2011_s2] ss:$0 sm:$0xff]  ;;  %s1201_s25 = sshll.u32 %s1698_s24, 4  ;;  %s1202_s25 = int_to_ptr.vmem [resolvable:$true] %s1201_s25 }
  0x52   :  { %1412 = vmatprep.subr.bf16.mxu1 %v1411_v7  ;;  %1419 = vmatprep.subr.bf16.mxu0 %v1693_v14  ;;  %v1838_v18 = vpack.c.bf16 %v282_v17, %v281_v16  ;;  %v1231_v29 = vld [vmem:[%s2014_s5] ss:$0 sm:$0xff]  ;;  %s1697_s5 = smov 32   ;;  %s1633_s28 = scalar_lea.vmem %s1202_s25, 32 }
  0x53   :  { %1414 = vmatpush3.bf16.msra.mxu1 %v1411_v7  ;;  %p1634_p4 = scmp.ne.s32.totalorder %s1202_s25, %s1633_s28  ;;  %p1638_p5 = scmp.lt.s32.totalorder %s1202_s25, %s1202_s25 }
  0x54   :  { %1306 = vmatmul.mubr.msk.f32.vlgmr.msra.gmra.mrb[0].mxu0 %vm102_vm0, %v92_v8  ;;  %1416 = vmatprep.subr.bf16.mxu1 %v1415_v15  ;;  %p1639_p6 = scmp.lt.s32.totalorder %s1633_s28, %s1633_s28 }
  0x55   :  { %1421 = vmatpush3.bf16.msra.mxu0 %v1833_v11  ;;  %1327 = vmatprep.mubr.msk.f32.mxu0 %vm1694_vm1, %v1695_v19 }
  0x56   :  { %1422 = vmatprep.subr.bf16.mxu0 %v1693_v14  ;;  %p1640_p7 = por %p1639_p6, %p1638_p5 }
  0x57   :  { %1418 = vmatpush3.bf16.msra.mxu1 %v1415_v15 }
  0x58   :  { %1425 = vmatprep.subr.bf16.mxu1 %v1693_v14  ;;  %p1641_p8 = pnand %p1640_p7, %p1634_p4 }
  0x59   :  { %1424 = vmatpush3.bf16.msra.mxu0 %v1838_v18 }
  0x5a   :  { %1431 = vmatprep.subr.bf16.mxu0 %v1693_v14 }
  0x5c   :  { %1328 = vmatmul.mubr.f32.vlgmr.msra.gmra.mrb[2].mxu0 %v1695_v19 }
  0x5d   :  { %1433 = vmatpush3.bf16.msra.mxu0 %v1833_v11  ;;  %1349 = vmatprep.mubr.msk.f32.mxu0 %vm1694_vm1, %v1695_v19 }
  0x5e   :  { %1434 = vmatprep.subr.bf16.mxu0 %v1693_v14 }
  0x61   :  { %1436 = vmatpush3.bf16.msra.mxu0 %v1838_v18 }
  0x62   :  { %1443 = vmatprep.subr.bf16.mxu0 %v1693_v14 }
 0x127   :  { %v1307_v21 = vpop.f32.mrb[0].mxu0 }
 0x128   :  { %v181_v22 = vadd.f32 %v1307_v21, %v1228_v20  ;;  %v175_v23 = vpop.f32.mrb[1].mxu0 }
 0x129   :  { %v176_v24 = vadd.f32 %v1228_v20, %v175_v23 }
 0x12a   :  { %v185_v26 = vmax.f32 %v181_v22, 0.0 }
 0x12b   :  { %v184_v25 = vmax.f32 %v176_v24, 0.0 }
 0x12d   :  { %1316 = vmatprep.mubr.msk.f32.mxu1 %vm197_vm2, %v184_v25 }
 0x12e   :  { %1317 = vmatmul.mubr.msk.f32.vlgmr.msra.gmra.mrb[0].mxu1 %vm197_vm2, %v185_v26 }
 0x12f   :  { %1427 = vmatpush3.bf16.msra.mxu1 %v1833_v11  ;;  %1338 = vmatprep.mubr.msk.f32.mxu1 %vm1694_vm1, %v1695_v19  ;;  %v352_v27 = vpop.f32.mrb[2].mxu0 }
 0x130   :  { %1428 = vmatprep.subr.bf16.mxu1 %v1693_v14  ;;  %v1329_v28 = vpop.f32.mrb[3].mxu0 }
 0x133   :  { %1430 = vmatpush3.bf16.msra.mxu1 %v1838_v18 }
 0x134   :  { %1437 = vmatprep.subr.bf16.mxu1 %v1693_v14 }
 0x201   :  { %v1318_v30 = vpop.f32.mrb[0].mxu1 }
 0x202   :  { %v1866_v31 = vadd.f32 %v1318_v30, %v1231_v29  ;;  %v270_v32 = vpop.f32.mrb[1].mxu1 }
 0x203   :  { %v1868_v33 = vadd.f32 %v1231_v29, %v270_v32 }
 0x205   :  { %v356_v34 = vadd.f32 %v352_v27, %v1868_v33 }
 0x207   :  { %1481 = vtanh.f32 %v356_v34  ;;  %v1234_v36 = vmul.f32 -1.442695, %v356_v34 }
 0x209   :  { %1483 = vpow2.f32 %v1234_v36 }
 0x211   :  { %v1482_v35 = vpop.eup %1481 }
 0x212   :  { %366 = vrot.lane.b32.xlu0 %v1482_v35, %s1696_s22 }
 0x213   :  { %v1484_v37 = vpop.eup %1483 }
 0x214   :  { %v360_v38 = vadd.f32 1.0, %v1484_v37 }
 0x216   :  { %1485 = vrcp.f32 %v360_v38 }
 0x220   :  { %v1486_v39 = vpop.eup %1485 }
 0x221   :  { %v364_v42 = vmul.f32 0.0, %v1486_v39 }
 0x284   :  { %v367_v40 = vpop.permute.xlu0 %366 }
 0x285   :  { %v369_v41 = vmul.f32 %v1486_v39, %v367_v40 }
 0x287   :  { %371 = vrot.lane.b32.xlu0 %v369_v41, %s1697_s5 }
 0x2f9   :  { %v372_v43 = vpop.permute.xlu0 %371 }
 0x2fa   :  { %v374_v44 = vadd.f32 %v372_v43, %v364_v42 }
 0x2fc   :  { %1487 = vtanh.f32 %v374_v44  ;;  %v471_v60 = vrot.slane %v374_v44, 6 }
 0x306   :  { %v1488_v45 = vpop.eup %1487 }
 0x307   :  { %377 = vrot.lane.b32.xlu1 %v1488_v45, %s1696_s22 }
 0x379   :  { %v378_v46 = vpop.permute.xlu1 %377 }
 0x37a   :  { %v380_v47 = vmul.f32 %v1486_v39, %v378_v46 }
 0x37c   :  { %382 = vrot.lane.b32.xlu1 %v380_v47, %s1697_s5 }
 0x3ee   :  { %v383_v48 = vpop.permute.xlu1 %382 }
 0x3ef   :  { %386 = vst.msk [vmem:[#allocation2] sm:$0x3] %vm385_vm3, %v383_v48  ;;  %1339 = vmatmul.mubr.msk.f32.vlgmr.msra.gmra.mrb[2].mxu1 %vm197_vm2, %v383_v48 }
 0x3f0   :  { %1439 = vmatpush3.bf16.msra.mxu1 %v1833_v11  ;;  %1360 = vmatprep.mubr.msk.f32.mxu1 %vm1694_vm1, %v1695_v19 }
 0x3f1   :  { %1440 = vmatprep.subr.bf16.mxu1 %v1693_v14 }
 0x3f4   :  { %1442 = vmatpush3.bf16.msra.mxu1 %v1838_v18 }
 0x3f5   :  { %1449 = vmatprep.subr.bf16.mxu1 %v1693_v14 }
 0x4c2   :  { %v455_v49 = vpop.f32.mrb[2].mxu1 }
 0x4c3   :  { %v460_v50 = vrot.slane %v455_v49, 6  ;;  %v1340_v51 = vpop.f32.mrb[3].mxu1 }
 0x4c5   :  { %v462_v52 = vadd.f32 %v460_v50, %v1868_v33 }
 0x4c7   :  { %1489 = vtanh.f32 %v462_v52  ;;  %v1236_v54 = vmul.f32 -1.442695, %v462_v52 }
 0x4c9   :  { %1491 = vpow2.f32 %v1236_v54 }
 0x4d1   :  { %v1490_v53 = vpop.eup %1489 }
 0x4d2   :  { %475 = vrot.lane.b32.xlu0 %v1490_v53, %s1696_s22 }
 0x4d3   :  { %v1492_v55 = vpop.eup %1491 }
 0x4d4   :  { %v466_v56 = vadd.f32 1.0, %v1492_v55 }
 0x4d6   :  { %1493 = vrcp.f32 %v466_v56 }
 0x4e0   :  { %v1494_v57 = vpop.eup %1493 }
 0x4e1   :  { %v473_v61 = vmul.f32 %v1494_v57, %v471_v60 }
 0x544   :  { %v476_v58 = vpop.permute.xlu0 %475 }
 0x545   :  { %v478_v59 = vmul.f32 %v1494_v57, %v476_v58 }
 0x547   :  { %480 = vrot.lane.b32.xlu1 %v478_v59, %s1697_s5 }
 0x5b9   :  { %v481_v62 = vpop.permute.xlu1 %480 }
 0x5ba   :  { %v483_v63 = vadd.f32 %v481_v62, %v473_v61 }
 0x5bc   :  { %1495 = vtanh.f32 %v483_v63  ;;  %v583_v20 = vrot.slane %v483_v63, 6 }
 0x5c6   :  { %v1496_v0 = vpop.eup %1495 }
 0x5c7   :  { %486 = vrot.lane.b32.xlu0 %v1496_v0, %s1696_s22 }
 0x639   :  { %v487_v1 = vpop.permute.xlu0 %486 }
 0x63a   :  { %v1887_v2 = vmul.f32 %v1494_v57, %v487_v1 }
 0x63c   :  { %v496_v3 = vrot.slane %v1887_v2, 2 }
 0x63e   :  { %497 = vrot.lane.b32.xlu1 %v496_v3, %s1697_s5 }
 0x6b0   :  { %v498_v4 = vpop.permute.xlu1 %497 }
 0x6b1   :  { %1350 = vmatmul.mubr.msk.f32.vlgmr.msra.gmra.mrb[4].mxu0 %vm197_vm2, %v498_v4 }
 0x6b2   :  { %1445 = vmatpush3.bf16.msra.mxu0 %v1833_v11  ;;  %1371 = vmatprep.mubr.msk.f32.mxu0 %vm1694_vm1, %v1695_v19 }
 0x6b3   :  { %1446 = vmatprep.subr.bf16.mxu0 %v1693_v14 }
 0x6b6   :  { %1448 = vmatpush3.bf16.msra.mxu0 %v1838_v18 }
 0x6b7   :  { %1455 = vmatprep.subr.bf16.mxu0 %v1693_v14 }
 0x784   :  { %v567_v5 = vpop.f32.mrb[4].mxu0 }
 0x785   :  { %v572_v6 = vrot.slane %v567_v5, 4  ;;  %v1351_v7 = vpop.f32.mrb[5].mxu0 }
 0x787   :  { %v574_v8 = vadd.f32 %v572_v6, %v1868_v33 }
 0x789   :  { %1497 = vtanh.f32 %v574_v8  ;;  %v1238_v10 = vmul.f32 -1.442695, %v574_v8 }
 0x78b   :  { %1499 = vpow2.f32 %v1238_v10 }
 0x793   :  { %v1498_v9 = vpop.eup %1497 }
 0x794   :  { %587 = vrot.lane.b32.xlu0 %v1498_v9, %s1696_s22 }
 0x795   :  { %v1500_v12 = vpop.eup %1499 }
 0x796   :  { %v578_v13 = vadd.f32 1.0, %v1500_v12 }
 0x798   :  { %1501 = vrcp.f32 %v578_v13 }
 0x7a2   :  { %v1502_v15 = vpop.eup %1501 }
 0x7a3   :  { %v585_v21 = vmul.f32 %v1502_v15, %v583_v20 }
 0x806   :  { %v588_v16 = vpop.permute.xlu0 %587 }
 0x807   :  { %v590_v17 = vmul.f32 %v1502_v15, %v588_v16 }
 0x809   :  { %592 = vrot.lane.b32.xlu1 %v590_v17, %s1697_s5 }
 0x87b   :  { %v593_v22 = vpop.permute.xlu1 %592 }
 0x87c   :  { %v595_v23 = vadd.f32 %v593_v22, %v585_v21 }
 0x87e   :  { %1503 = vtanh.f32 %v595_v23  ;;  %v695_v42 = vrot.slane %v595_v23, 6 }
 0x888   :  { %v1504_v24 = vpop.eup %1503 }
 0x889   :  { %598 = vrot.lane.b32.xlu0 %v1504_v24, %s1696_s22 }
 0x8fb   :  { %v599_v25 = vpop.permute.xlu0 %598 }
 0x8fc   :  { %v1902_v26 = vmul.f32 %v1502_v15, %v599_v25 }
 0x8fe   :  { %v608_v27 = vrot.slane %v1902_v26, 4 }
 0x900   :  { %609 = vrot.lane.b32.xlu1 %v608_v27, %s1697_s5 }
 0x972   :  { %v610_v28 = vpop.permute.xlu1 %609 }
 0x973   :  { %1361 = vmatmul.mubr.msk.f32.vlgmr.msra.gmra.mrb[4].mxu1 %vm197_vm2, %v610_v28 }
 0x974   :  { %1451 = vmatpush3.bf16.msra.mxu1 %v1833_v11  ;;  %1382 = vmatprep.mubr.msk.f32.mxu1 %vm1694_vm1, %v1695_v19 }
 0x975   :  { %1452 = vmatprep.subr.bf16.mxu1 %v1693_v14 }
 0x978   :  { %1454 = vmatpush3.bf16.msra.mxu1 %v1838_v18 }
 0x979   :  { %1461 = vmatprep.subr.bf16.mxu1 %v1693_v14 }
 0xa46   :  { %v679_v29 = vpop.f32.mrb[4].mxu1 }
 0xa47   :  { %v684_v30 = vrot.slane %v679_v29, 2  ;;  %v1362_v32 = vpop.f32.mrb[5].mxu1 }
 0xa49   :  { %v686_v34 = vadd.f32 %v684_v30, %v1868_v33 }
 0xa4b   :  { %1505 = vtanh.f32 %v686_v34  ;;  %v1240_v36 = vmul.f32 -1.442695, %v686_v34 }
 0xa4d   :  { %1507 = vpow2.f32 %v1240_v36 }
 0xa55   :  { %v1506_v35 = vpop.eup %1505 }
 0xa56   :  { %699 = vrot.lane.b32.xlu0 %v1506_v35, %s1696_s22 }
 0xa57   :  { %v1508_v37 = vpop.eup %1507 }
 0xa58   :  { %v690_v38 = vadd.f32 1.0, %v1508_v37 }
 0xa5a   :  { %1509 = vrcp.f32 %v690_v38 }
 0xa64   :  { %v1510_v39 = vpop.eup %1509 }
 0xa65   :  { %v697_v43 = vmul.f32 %v1510_v39, %v695_v42 }
 0xac8   :  { %v700_v40 = vpop.permute.xlu0 %699 }
 0xac9   :  { %v702_v41 = vmul.f32 %v1510_v39, %v700_v40 }
 0xacb   :  { %704 = vrot.lane.b32.xlu1 %v702_v41, %s1697_s5 }
 0xb3d   :  { %v705_v44 = vpop.permute.xlu1 %704 }
 0xb3e   :  { %v707_v45 = vadd.f32 %v705_v44, %v697_v43 }
 0xb40   :  { %1511 = vtanh.f32 %v707_v45  ;;  %v804_v60 = vrot.slane %v707_v45, 6 }
 0xb4a   :  { %v1512_v33 = vpop.eup %1511 }
 0xb4b   :  { %710 = vrot.lane.b32.xlu0 %v1512_v33, %s1696_s22 }
 0xbbd   :  { %v711_v46 = vpop.permute.xlu0 %710 }
 0xbbe   :  { %v1917_v47 = vmul.f32 %v1510_v39, %v711_v46 }
 0xbc0   :  { %v720_v48 = vrot.slane %v1917_v47, 6 }
 0xbc2   :  { %721 = vrot.lane.b32.xlu1 %v720_v48, %s1697_s5 }
 0xc34   :  { %v722_v49 = vpop.permute.xlu1 %721 }
 0xc35   :  { %1372 = vmatmul.mubr.msk.f32.vlgmr.msra.gmra.mrb[6].mxu0 %vm197_vm2, %v722_v49 }
 0xc36   :  { %1457 = vmatpush3.bf16.msra.mxu0 %v1833_v11  ;;  %1393 = vmatprep.mubr.msk.f32.mxu0 %vm1694_vm1, %v1695_v19 }
 0xc37   :  { %1458 = vmatprep.subr.bf16.mxu0 %v1693_v14 }
 0xc3a   :  { %1460 = vmatpush3.bf16.msra.mxu0 %v1838_v18 }
 0xd08   :  { %v791_v50 = vpop.f32.mrb[6].mxu0 }
 0xd09   :  { %v795_v51 = vadd.f32 %v791_v50, %v1866_v31  ;;  %v1373_v52 = vpop.f32.mrb[7].mxu0 }
 0xd0b   :  { %1513 = vtanh.f32 %v795_v51  ;;  %v1242_v54 = vmul.f32 -1.442695, %v795_v51 }
 0xd0d   :  { %1515 = vpow2.f32 %v1242_v54 }
 0xd15   :  { %v1514_v53 = vpop.eup %1513 }
 0xd16   :  { %808 = vrot.lane.b32.xlu0 %v1514_v53, %s1696_s22 }
 0xd17   :  { %v1516_v55 = vpop.eup %1515 }
 0xd18   :  { %v799_v56 = vadd.f32 1.0, %v1516_v55 }
 0xd1a   :  { %1517 = vrcp.f32 %v799_v56 }
 0xd24   :  { %v1518_v57 = vpop.eup %1517 }
 0xd25   :  { %v806_v61 = vmul.f32 %v1518_v57, %v804_v60 }
 0xd88   :  { %v809_v58 = vpop.permute.xlu0 %808 }
 0xd89   :  { %v811_v59 = vmul.f32 %v1518_v57, %v809_v58 }
 0xd8b   :  { %813 = vrot.lane.b32.xlu1 %v811_v59, %s1697_s5 }
 0xdfd   :  { %v814_v62 = vpop.permute.xlu1 %813 }
 0xdfe   :  { %v816_v63 = vadd.f32 %v814_v62, %v806_v61 }
 0xe00   :  { %1519 = vtanh.f32 %v816_v63 }
 0xe0a   :  { %v1520_v0 = vpop.eup %1519 }
 0xe0b   :  { %819 = vrot.lane.b32.xlu0 %v1520_v0, %s1696_s22 }
 0xe7d   :  { %v820_v1 = vpop.permute.xlu0 %819 }
 0xe7e   :  { %v822_v3 = vmul.f32 %v1518_v57, %v820_v1 }
 0xe80   :  { %824 = vrot.lane.b32.xlu1 %v822_v3, %s1697_s5 }
 0xef2   :  { %v825_v4 = vpop.permute.xlu1 %824 }
 0xef3   :  { %827 = vst.msk [vmem:[#allocation2 + $0x8] sm:$0x3] %vm385_vm3, %v825_v4  ;;  %1383 = vmatmul.mubr.msk.f32.vlgmr.msra.gmra.mrb[6].mxu1 %vm197_vm2, %v825_v4 }
 0xef4   :  { %1463 = vmatpush3.bf16.msra.mxu1 %v1833_v11  ;;  %1404 = vmatprep.mubr.msk.f32.mxu1 %vm1694_vm1, %v1695_v19 }
 0xef5   :  { %1464 = vmatprep.subr.bf16.mxu1 %v1693_v14  ;;  %v912_v14 = vrot.slane %v816_v63, 6 }
 0xef8   :  { %1466 = vmatpush3.bf16.msra.mxu1 %v1838_v18 }
 0xfc6   :  { %v896_v5 = vpop.f32.mrb[6].mxu1 }
 0xfc7   :  { %v901_v6 = vrot.slane %v896_v5, 6  ;;  %v1384_v7 = vpop.f32.mrb[7].mxu1  ;;  %v1249_v5 = vld [vmem:[%s2015_s6] ss:$0 sm:$0xff] }
 0xfc9   :  { %v903_v8 = vadd.f32 %v901_v6, %v1866_v31 }
 0xfcb   :  { %1521 = vtanh.f32 %v903_v8  ;;  %v1244_v10 = vmul.f32 -1.442695, %v903_v8 }
 0xfcd   :  { %1523 = vpow2.f32 %v1244_v10 }
 0xfd5   :  { %v1522_v9 = vpop.eup %1521 }
 0xfd6   :  { %916 = vrot.lane.b32.xlu0 %v1522_v9, %s1696_s22 }
 0xfd7   :  { %v1524_v12 = vpop.eup %1523 }
 0xfd8   :  { %v907_v11 = vadd.f32 1.0, %v1524_v12 }
 0xfda   :  { %1525 = vrcp.f32 %v907_v11 }
 0xfe4   :  { %v1526_v13 = vpop.eup %1525 }
 0xfe5   :  { %v914_v18 = vmul.f32 %v1526_v13, %v912_v14 }
0x1048   :  { %v917_v19 = vpop.permute.xlu0 %916 }
0x1049   :  { %v919_v15 = vmul.f32 %v1526_v13, %v917_v19 }
0x104b   :  { %921 = vrot.lane.b32.xlu1 %v919_v15, %s1697_s5 }
0x10bd   :  { %v922_v16 = vpop.permute.xlu1 %921 }
0x10be   :  { %v924_v17 = vadd.f32 %v922_v16, %v914_v18 }
0x10c0   :  { %1527 = vtanh.f32 %v924_v17  ;;  %v1023_v39 = vrot.slane %v924_v17, 6 }
0x10ca   :  { %v1528_v20 = vpop.eup %1527 }
0x10cb   :  { %927 = vrot.lane.b32.xlu0 %v1528_v20, %s1696_s22 }
0x113d   :  { %v928_v21 = vpop.permute.xlu0 %927 }
0x113e   :  { %v1943_v22 = vmul.f32 %v1526_v13, %v928_v21 }
0x1140   :  { %v936_v23 = vrot.slane %v1943_v22, 2 }
0x1142   :  { %937 = vrot.lane.b32.xlu1 %v936_v23, %s1697_s5 }
0x11b4   :  { %v938_v24 = vpop.permute.xlu1 %937 }
0x11b5   :  { %1394 = vmatmul.mubr.msk.f32.vlgmr.msra.gmra.mrb[8].mxu0 %vm197_vm2, %v938_v24 }
0x1288   :  { %v1007_v25 = vpop.f32.mrb[8].mxu0 }
0x1289   :  { %v1012_v27 = vrot.slane %v1007_v25, 4  ;;  %v1395_v28 = vpop.f32.mrb[9].mxu0 }
0x128b   :  { %v1014_v29 = vadd.f32 %v1012_v27, %v1866_v31 }
0x128d   :  { %1529 = vtanh.f32 %v1014_v29  ;;  %v1246_v32 = vmul.f32 -1.442695, %v1014_v29 }
0x128f   :  { %1531 = vpow2.f32 %v1246_v32 }
0x1297   :  { %v1530_v30 = vpop.eup %1529 }
0x1298   :  { %1027 = vrot.lane.b32.xlu0 %v1530_v30, %s1696_s22 }
0x1299   :  { %v1532_v34 = vpop.eup %1531 }
0x129a   :  { %v1018_v35 = vadd.f32 1.0, %v1532_v34 }
0x129c   :  { %1533 = vrcp.f32 %v1018_v35 }
0x12a6   :  { %v1534_v36 = vpop.eup %1533 }
0x12a7   :  { %v1025_v40 = vmul.f32 %v1534_v36, %v1023_v39 }
0x130a   :  { %v1028_v37 = vpop.permute.xlu0 %1027 }
0x130b   :  { %v1030_v38 = vmul.f32 %v1534_v36, %v1028_v37 }
0x130d   :  { %1032 = vrot.lane.b32.xlu1 %v1030_v38, %s1697_s5 }
0x137f   :  { %v1033_v41 = vpop.permute.xlu1 %1032 }
0x1380   :  { %v1035_v42 = vadd.f32 %v1033_v41, %v1025_v40 }
0x1382   :  { %1535 = vtanh.f32 %v1035_v42 }
0x138c   :  { %v1536_v43 = vpop.eup %1535 }
0x138d   :  { %1038 = vrot.lane.b32.xlu0 %v1536_v43, %s1696_s22 }
0x13ff   :  { %v1039_v44 = vpop.permute.xlu0 %1038 }
0x1400   :  { %v1041_v45 = vmul.f32 %v1534_v36, %v1039_v44 }
0x1402   :  { %v1047_v33 = vrot.slane %v1041_v45, 4 }
0x1404   :  { %1048 = vrot.lane.b32.xlu1 %v1047_v33, %s1697_s5 }
0x1476   :  { %v1049_v46 = vpop.permute.xlu1 %1048 }
0x1477   :  { %1405 = vmatmul.mubr.msk.f32.vlgmr.msra.gmra.mrb[8].mxu1 %vm197_vm2, %v1049_v46 }
0x154a   :  { %v1118_v48 = vpop.f32.mrb[8].mxu1 }
0x154b   :  { %v1123_v49 = vrot.slane %v1118_v48, 2  ;;  %v1406_v50 = vpop.f32.mrb[9].mxu1 }
0x154d   :  { %v1125_v51 = vadd.f32 %v1123_v49, %v1866_v31  ;;  %v1134_v31 = vrot.slane %v1035_v42, 6 }
0x154f   :  { %1537 = vtanh.f32 %v1125_v51  ;;  %v1248_v53 = vmul.f32 -1.442695, %v1125_v51 }
0x1551   :  { %1539 = vpow2.f32 %v1248_v53 }
0x1559   :  { %v1538_v52 = vpop.eup %1537 }
0x155a   :  { %1138 = vrot.lane.b32.xlu0 %v1538_v52, %s1696_s22 }
0x155b   :  { %v1540_v54 = vpop.eup %1539 }
0x155c   :  { %v1129_v55 = vadd.f32 1.0, %v1540_v54 }
0x155e   :  { %1541 = vrcp.f32 %v1129_v55 }
0x1568   :  { %v1542_v56 = vpop.eup %1541 }
0x1569   :  { %v1136_v59 = vmul.f32 %v1542_v56, %v1134_v31 }
0x15cc   :  { %v1139_v57 = vpop.permute.xlu0 %1138 }
0x15cd   :  { %v1141_v58 = vmul.f32 %v1542_v56, %v1139_v57 }
0x15cf   :  { %1143 = vrot.lane.b32.xlu1 %v1141_v58, %s1697_s5 }
0x15d3   :  { %491 = vrot.lane.b32.xlu1 %v1887_v2, %s1697_s5 }
0x15d7   :  { %715 = vrot.lane.b32.xlu1 %v1917_v47, %s1697_s5 }
0x15db   :  { %1043 = vrot.lane.b32.xlu1 %v1041_v45, %s1697_s5 }
0x1641   :  { %v1144_v60 = vpop.permute.xlu1 %1143 }
0x1642   :  { %v1146_v61 = vadd.f32 %v1144_v60, %v1136_v59 }
0x1644   :  { %1543 = vtanh.f32 %v1146_v61 }
0x1645   :  { %v492_v62 = vpop.permute.xlu1 %491 }
0x1646   :  { %495 = vst.msk [vmem:[#allocation2] sm:$0xc] %vm494_vm4, %v492_v62 }
0x1649   :  { %v716_v63 = vpop.permute.xlu1 %715 }
0x164a   :  { %719 = vst.msk [vmem:[#allocation2] sm:$0xc0] %vm718_vm5, %v716_v63 }
0x164d   :  { %v1044_v2 = vpop.permute.xlu1 %1043 }
0x164e   :  { %v1544_v0 = vpop.eup %1543  ;;  %1046 = vst.msk [vmem:[#allocation2 + $0x8] sm:$0x30] %vm606_vm6, %v1044_v2 }
0x164f   :  { %1149 = vrot.lane.b32.xlu0 %v1544_v0, %s1696_s22 }
0x1653   :  { %603 = vrot.lane.b32.xlu0 %v1902_v26, %s1697_s5 }
0x1657   :  { %932 = vrot.lane.b32.xlu0 %v1943_v22, %s1697_s5 }
0x16c1   :  { %v1150_v47 = vpop.permute.xlu0 %1149 }
0x16c2   :  { %v1152_v1 = vmul.f32 %v1542_v56, %v1150_v47 }
0x16c4   :  { %1154 = vrot.lane.b32.xlu0 %v1152_v1, %s1697_s5 }
0x16c5   :  { %v604_v3 = vpop.permute.xlu0 %603 }
0x16c6   :  { %607 = vst.msk [vmem:[#allocation2] sm:$0x30] %vm606_vm6, %v604_v3 }
0x16c9   :  { %v933_v4 = vpop.permute.xlu0 %932 }
0x16ca   :  { %935 = vst.msk [vmem:[#allocation2 + $0x8] sm:$0xc] %vm494_vm4, %v933_v4 }
0x16cd   :  { %v1158_v6 = vld [vmem:[#allocation2] sm:$0xff] }
0x16ce   :  { %v1167_v7 = vmul.f32 %v1249_v5, %v1158_v6 }
0x16d0   :  { %v1169_v26 = vsel %vm197_vm2, %v1167_v7, 0.0 }
0x16d1   :  { %1170 = vadd.xlane.f32.xlu1 %v1169_v26 }
0x1736   :  { %v1155_v8 = vpop.permute.xlu0 %1154 }
0x1737   :  { %1157 = vst.msk [vmem:[#allocation2 + $0x8] sm:$0xc0] %vm718_vm5, %v1155_v8  ;;  %1187 = vst.msk [vmem:[#allocation12 - $0x6] sm:$0xc0] %vm718_vm5, %v1155_v8 }
0x173e   :  { %v1159_v9 = vld [vmem:[#allocation2 + $0x8] sm:$0xff] }
0x173f   :  { %v1168_v10 = vmul.f32 %v1249_v5, %v1159_v9 }
0x1741   :  { %v1172_v12 = vsel %vm197_vm2, %v1168_v10, 0.0 }
0x1742   :  { %1173 = vadd.xlane.f32.xlu0 %v1172_v12 }
0x1743   :  { %1644 = shalt.err (!%p1641_p8)
}
0x1744   :  { %s1645_s30 = scalar_lea.hbm %s2018_s9, 32 }
0x1745   :  { %p1646_p9 = scmp.ne.s32.totalorder %s2018_s9, %s1645_s30  ;;  %p1649_p10 = scmp.lt.u32.totalorder %s1645_s30, %s2018_s9 }
0x1747   :  { %p1651_p11 = pnand %p1649_p10, %p1646_p9 }
0x1749   :  { %1654 = shalt.err (!%p1651_p11)
}
0x174a   :  { %1204 = dma.vmem_to_hbm [thread:$0]  %s1202_s25, 32, %s2018_s9, [#allocation6]   ;;  %v1250_v11 = vld [vmem:[#allocation3] ss:$0 sm:$0xff]  ;;  %vm1184_vm7 = vcmask 7168  }
0x174b   :  { %s1699_s15 = smov 96   ;;  %s1700_s1 = smov [#allocation13]  }
0x174c   :  { %s1211_s16 = sshll.u32 %s1700_s1, 4  ;;  %s1212_s16 = int_to_ptr.vmem [resolvable:$true] %s1211_s16 }
0x174d   :  { %s1655_s9 = scalar_lea.vmem %s1212_s16, 32  ;;  %p1660_p13 = scmp.lt.s32.totalorder %s1212_s16, %s1212_s16 }
0x174e   :  { %p1656_p12 = scmp.ne.s32.totalorder %s1212_s16, %s1655_s9  ;;  %p1661_p0 = scmp.lt.s32.totalorder %s1655_s9, %s1655_s9 }
0x1750   :  { %p1662_p1 = por %p1661_p0, %p1660_p13 }
0x1752   :  { %p1663_p2 = pnand %p1662_p1, %p1656_p12 }
0x1758   :  { %1189 = vrot.lane.b32.xlu0 %v1146_v61, %s1699_s15 }
0x175e   :  { %v1171_v13 = vpop.xlane.xlu1 %1170 }
0x175f   :  { %v1182_v19 = vadd.f32 %v1250_v11, %v1171_v13 }
0x1761   :  { %1185 = vst.msk [vmem:[%s2017_s8] sm:$0xff] %vm1184_vm7, %v1182_v19 }
0x17cf   :  { %v1174_v15 = vpop.xlane.xlu0 %1173 }
0x17d0   :  { %v1183_v14 = vadd.f32 %v1250_v11, %v1174_v15 }
0x17d2   :  { %1186 = vst.msk [vmem:[%s2017_s8 + $0x8] sm:$0xff] %vm1184_vm7, %v1183_v14 }
0x17d3   :  { %v1190_v18 = vpop.permute.xlu0 %1189 }
0x17d4   :  { %1192 = vst.msk [vmem:[#allocation13 - $0x6] sm:$0xc0] %vm718_vm5, %v1190_v18 }
0x17d5   :  { %1666 = shalt.err (!%p1663_p2)
}
0x17d6   :  { %s1667_s26 = scalar_lea.hbm %s2019_s10, 32 }
0x17d7   :  { %p1668_p3 = scmp.ne.s32.totalorder %s2019_s10, %s1667_s26  ;;  %p1671_p4 = scmp.lt.u32.totalorder %s1667_s26, %s2019_s10 }
0x17d9   :  { %p1673_p5 = pnand %p1671_p4, %p1668_p3 }
0x17db   :  { %1676 = shalt.err (!%p1673_p5)
}
0x17dc   :  { %1214 = dma.vmem_to_hbm [thread:$0]  %s1212_s16, 32, %s2019_s10, [#allocation14]  }
0x17dd   :  { %1683 = dma.done.wait [#allocation6], 32  }
0x17de   :  { %1684 = vsyncadd [#allocation6], 4294967264 }
0x17df   :  { %1685 = dma.done.wait [#allocation14], 32  }
0x17e0   :  { %1686 = vsyncadd [#allocation14], 4294967264 }
0x17e1   :  { %1223 = vsyncpa [#allocation5], 1 }
0x17e2   :  { %1224 = vsyncpa [#allocation8], 1 }
0x17e3   :  { %1225 = vsyncpa [#allocation11], 1 }
0x17e4   :  { %1226 = vsyncpa [#allocation6], 1 }
0x17e5   :  { %1227 = vsyncpa [#allocation14], 1 }

</bundles_post_ra>
